<compile_context>
chip_gen: v5e
topology: v5e:2x2
jax: 0.10.0
libtpu: 0.0.40
codegen_flags: <defaults>
</compile_context>

<pallas_src>
import functools

import jax
import jax.numpy as jnp
from jax.experimental import pallas as pl
from jax.experimental.pallas import tpu as pltpu

# Module constants from the PyTorch source.
nc = 1
ngf = 64
nz = 100


def _nbytes(*arrays):
    return int(sum(int(a.size) * a.dtype.itemsize for a in arrays))


def _cost(flops, nbytes, transc=0):
    return pl.CostEstimate(flops=int(flops), transcendentals=int(transc),
                           bytes_accessed=int(nbytes))


@functools.lru_cache(maxsize=None)
def _roll_is_jnp_convention():
    """Probe pltpu.roll direction once (True iff it matches jnp.roll)."""
    def _probe(x_ref, o_ref):
        o_ref[...] = pltpu.roll(x_ref[...], 1, 0)

    x = jnp.arange(8 * 128, dtype=jnp.float32).reshape(8, 128)
    y = pl.pallas_call(
        _probe, out_shape=jax.ShapeDtypeStruct((8, 128), jnp.float32))(x)
    jnp_like = bool(y[1, 0] == x[0, 0])   # row 0 moved to row 1
    opposite = bool(y[0, 0] == x[1, 0])   # row 1 moved to row 0
    assert jnp_like != opposite, "could not determine pltpu.roll convention"
    return jnp_like


# --------------------------------------------------------------------------
# Kernels
# --------------------------------------------------------------------------
def _gemm_relu_kernel(x_ref, w_ref, b_ref, o_ref):
    """Layer 1: ConvTranspose(nz, 512, 4, 1, 0) on a 1x1 input == GEMM+BN+ReLU."""
    y = jnp.dot(x_ref[...], w_ref[...],
                preferred_element_type=jnp.float32) + b_ref[...]
    o_ref[...] = jnp.maximum(y, 0.0).astype(o_ref.dtype)


def _convt_mxu_kernel(x_ref, w_ref, b_ref, o_ref, *, H, W, WP, roll_jnp):
    """ConvTranspose2d(k=4, s=2, p=1) + BN shift + ReLU via phase decomposition.

    x_ref: (1, H+2, WP, Cin) bf16  rows zero-padded by 1 top/bottom, width
                                   right-zero-padded to WP (multiple of 16)
    w_ref: (4, 4, Cin, TC)   bf16  [phase=2*py+px, tap=2*dy+dx, ci, co]
    b_ref: (1, TC)           f32   folded BN shift
    o_ref: (2, 2, 1, H, W, TC) bf16  compact phase slabs (pad cols dropped)
    """
    m = H * WP
    cin = x_ref.shape[-1]
    tc = o_ref.shape[-1]

    # Three distinct row windows (a = py + dy in {0,1,2}); tile-exact fold.
    lhs = [jnp.reshape(x_ref[0, a:a + H], (m, cin)) for a in range(3)]
    shift = b_ref[...]

    for ph in range(4):
        py, px = divmod(ph, 2)
        acc = shift                                   # broadcasts to (m, tc)
        for dx in range(2):
            p = (jnp.dot(lhs[py], w_ref[ph, dx],
                         preferred_element_type=jnp.float32)
                 + jnp.dot(lhs[py + 1], w_ref[ph, 2 + dx],
                           preferred_element_type=jnp.float32))
            # Output col c needs input col c + (px + dx) - 1:  p'[q] = p[q+delta].
            delta = px + dx - 1
            if delta != 0:
                amount = (-delta) % m if roll_jnp else delta % m
                # Wrapped rows land only in pad columns (zero or discarded).
                p = pltpu.roll(p, amount, 0)
            acc = acc + p
        y = jnp.maximum(acc, 0.0)
        y = jnp.reshape(y, (H, WP, tc))[:, :W, :]     # drop alignment pad cols
        o_ref[py, px, 0] = y.astype(o_ref.dtype)


def _convt_vpu_kernel(x_ref, w_ref, b_ref, o_ref, *, H, W, WP):
    """Final ConvTranspose2d(ngf, 1, 4, 2, 1) + Tanh (Cout=1: VPU + lane reduce).

    x_ref: (1, H+2, WP, Cin) bf16 ; w_ref: (4, 4, 1, Cin) f32
    b_ref: (1, 1) f32 ; o_ref: (2, 2, 1, H, W) f32   (width on lanes)
    """
    cin = x_ref.shape[-1]
    lhs = [x_ref[0, a:a + H].astype(jnp.float32) for a in range(3)]  # (H,WP,Cin)
    zcol = jnp.zeros((H, 1), jnp.float32)
    shift = b_ref[...]                                 # (1, 1)

    for ph in range(4):
        py, px = divmod(ph, 2)
        acc = shift                                    # broadcasts to (H, WP)
        for dx in range(2):
            # dy taps accumulated un-reduced -> a single lane reduce per dx.
            u = (lhs[py] * w_ref[ph, dx].reshape(1, 1, cin)
                 + lhs[py + 1] * w_ref[ph, 2 + dx].reshape(1, 1, cin))
            p = jnp.sum(u, axis=-1)                    # (H, WP)
            boff = px + dx                             # need col c + boff - 1
            if boff == 0:
                p = jnp.concatenate([zcol, p[:, :-1]], axis=1)
            elif boff == 2:
                p = jnp.concatenate([p[:, 1:], zcol], axis=1)
            acc = acc + p
        y = jnp.tanh(acc)
        o_ref[py, px, 0] = y[:, :W].astype(o_ref.dtype)


# --------------------------------------------------------------------------
# Layer wrappers
# --------------------------------------------------------------------------
def dense_layer(z2d, w_eff, shift, n_tiles=2):
    """Layer 1 as a GEMM over Cout tiles (weight streaming)."""
    batch = z2d.shape[0]
    K, NC = w_eff.shape
    mp = -(-batch // 8) * 8
    x = jnp.pad(z2d, ((0, mp - batch),
                      (0, K - z2d.shape[1]))).astype(jnp.bfloat16)
    tn = NC // n_tiles
    out = pl.pallas_call(
        _gemm_relu_kernel,
        out_shape=jax.ShapeDtypeStruct((mp, NC), jnp.bfloat16),
        grid_spec=pltpu.PrefetchScalarGridSpec(
            num_scalar_prefetch=0,
            grid=(n_tiles,),
            in_specs=[
                pl.BlockSpec((mp, K), lambda j: (0, 0)),
                pl.BlockSpec((K, tn), lambda j: (0, j)),
                pl.BlockSpec((1, tn), lambda j: (0, j)),
            ],
            out_specs=pl.BlockSpec((mp, tn), lambda j: (0, j)),
        ),
        compiler_params=pltpu.CompilerParams(dimension_semantics=("parallel",)),
        cost_estimate=_cost(2 * mp * K * NC,
                            _nbytes(x, w_eff, shift) + mp * NC * 2),
    )(x, w_eff, shift)
    return out[:batch]


def _padded_width(W):
    """Width pad: multiple of 16 (bf16 fold tile-exactness), >= W + 1."""
    return max(16, -(-(W + 1) // 16) * 16)


def _pad_input(x, WP):
    return jnp.pad(x, ((0, 0), (1, 1), (0, WP - x.shape[2]), (0, 0)))


def _assemble_phases(o, batch, H, W):
    """(2, 2, B, H, W, C) compact phase slabs -> (B, 2H, 2W, C) NHWC."""
    C = o.shape[-1]
    o = o.transpose(2, 3, 0, 4, 1, 5)                  # (B, H, py, W, px, C)
    return o.reshape(batch, 2 * H, 2 * W, C)


def conv_transpose_mxu(x, w_eff, shift, co_tiles=1):
    """ConvTranspose2d(Cin, Cout, 4, 2, 1) + BN shift + ReLU (NHWC bf16)."""
    batch, H, W, Cin = x.shape
    Cout = shift.shape[1]
    tc = Cout // co_tiles
    WP = _padded_width(W)
    xp = _pad_input(x, WP)
    out = pl.pallas_call(
        functools.partial(_convt_mxu_kernel, H=H, W=W, WP=WP,
                          roll_jnp=_roll_is_jnp_convention()),
        out_shape=jax.ShapeDtypeStruct((2, 2, batch, H, W, Cout), jnp.bfloat16),
        grid_spec=pltpu.PrefetchScalarGridSpec(
            num_scalar_prefetch=0,
            grid=(co_tiles, batch),        # Cout tile is the slow axis: weights
            in_specs=[                     # stay VMEM-resident across batch.
                pl.BlockSpec((1, H + 2, WP, Cin), lambda c, b: (b, 0, 0, 0)),
                pl.BlockSpec((4, 4, Cin, tc), lambda c, b: (0, 0, 0, c)),
                pl.BlockSpec((1, tc), lambda c, b: (0, c)),
            ],
            out_specs=pl.BlockSpec((2, 2, 1, H, W, tc),
                                   lambda c, b: (0, 0, b, 0, 0, c)),
        ),
        compiler_params=pltpu.CompilerParams(
            dimension_semantics=("parallel", "parallel")),
        cost_estimate=_cost(2 * 16 * batch * H * WP * Cin * Cout,
                            _nbytes(xp, w_eff, shift)
                            + 4 * batch * H * W * Cout * 2),
    )(xp, w_eff, shift)
    return _assemble_phases(out, batch, H, W)


def conv_transpose_final(x, w_eff, shift):
    """Final ConvTranspose2d(ngf, nc=1, 4, 2, 1) + Tanh -> (B, 2H, 2W) f32."""
    batch, H, W, Cin = x.shape
    WP = _padded_width(W)
    xp = _pad_input(x, WP)
    out = pl.pallas_call(
        functools.partial(_convt_vpu_kernel, H=H, W=W, WP=WP),
        out_shape=jax.ShapeDtypeStruct((2, 2, batch, H, W), jnp.float32),
        grid_spec=pltpu.PrefetchScalarGridSpec(
            num_scalar_prefetch=0,
            grid=(batch,),
            in_specs=[
                pl.BlockSpec((1, H + 2, WP, Cin), lambda b: (b, 0, 0, 0)),
                pl.BlockSpec((4, 4, 1, Cin), lambda b: (0, 0, 0, 0)),
                pl.BlockSpec((1, 1), lambda b: (0, 0)),
            ],
            out_specs=pl.BlockSpec((2, 2, 1, H, W), lambda b: (0, 0, b, 0, 0)),
        ),
        compiler_params=pltpu.CompilerParams(dimension_semantics=("parallel",)),
        cost_estimate=_cost(2 * 16 * batch * H * WP * Cin,
                            _nbytes(xp, w_eff, shift) + 4 * batch * H * W * 4,
                            transc=4 * batch * H * WP),
    )(xp, w_eff, shift)
    o = out.transpose(2, 3, 0, 4, 1)                   # (B, H, py, W, px)
    return o.reshape(batch, 2 * H, 2 * W)


# --------------------------------------------------------------------------
# Parameters, forward pass, pure-JAX reference
# --------------------------------------------------------------------------
def init_raw_params(key):
    """Synthetic DCGAN weights + eval-mode BatchNorm affine (mean=0, var=1)."""
    # TODO(synk): training-mode BatchNorm (batch statistics) is not modeled.
    eps = 1e-5
    dims = [(nz, ngf * 8), (ngf * 8, ngf * 4), (ngf * 4, ngf * 2),
            (ngf * 2, ngf), (ngf, nc)]
    raw = []
    for i, (cin, cout) in enumerate(dims):
        key, kw, kg, kb = jax.random.split(key, 4)
        w = 0.02 * jax.random.normal(kw, (cin, cout, 4, 4), jnp.float32)
        if i < 4:   # layers followed by BatchNorm2d
            gamma = 1.0 + 0.02 * jax.random.normal(kg, (cout,), jnp.float32)
            beta = 0.02 * jax.random.normal(kb, (cout,), jnp.float32)
            scale = gamma / jnp.sqrt(1.0 + eps)        # running var=1, mean=0
            shift = beta
        else:       # final layer: no BN, just Tanh
            scale = jnp.ones((cout,), jnp.float32)
            shift = jnp.zeros((cout,), jnp.float32)
        raw.append((w, scale, shift))
    return raw


def preprocess_params(raw):
    """Fold BN scale into bf16 weights; build phase/tap decomposed layouts."""
    params = []
    for i, (w, scale, shift) in enumerate(raw):
        cin, cout = w.shape[0], w.shape[1]
        ws = w * scale[None, :, None, None]
        if i == 0:
            # Stride-1 layer on a 1x1 input: plain GEMM weight, K padded to 128.
            w_eff = ws.transpose(0, 2, 3, 1).reshape(cin, 16 * cout)
            w_eff = jnp.pad(w_eff, ((0, 128 - cin), (0, 0))).astype(jnp.bfloat16)
            b_eff = jnp.tile(shift, 16).reshape(1, 16 * cout)
        else:
            # w_eff[2*py+px, 2*dy+dx, ci, co] = w[ci, co, 3-py-2dy, 3-px-2dx]
            phases = []
            for ph in range(4):
                py, px = divmod(ph, 2)
                phases.append(jnp.stack(
                    [ws[:, :, 3 - py - 2 * (t // 2), 3 - px - 2 * (t % 2)]
                     for t in range(4)]))
            w_eff = jnp.stack(phases)                  # (4, 4, cin, cout)
            if cout == 1:
                w_eff = w_eff.transpose(0, 1, 3, 2)    # (4, 4, 1, cin) f32 VPU
                b_eff = shift.reshape(1, 1)
            else:
                w_eff = w_eff.astype(jnp.bfloat16)
                b_eff = shift.reshape(1, cout)
        params.append((w_eff, b_eff))
    return params


def generator_forward(params, z):
    """z: (batch, nz, 1, 1) -> image: (batch, nc, 64, 64), NCHW."""
    batch = z.shape[0]
    (w1, b1), (w2, b2), (w3, b3), (w4, b4), (w5, b5) = params
    x = dense_layer(z.reshape(batch, nz), w1, b1)          # (B, 16*512) bf16
    x = x.reshape(batch, 4, 4, ngf * 8)                    # NHWC
    x = conv_transpose_mxu(x, w2, b2, co_tiles=2)          # (B, 8, 8, 256)
    x = conv_transpose_mxu(x, w3, b3)                      # (B, 16, 16, 128)
    x = conv_transpose_mxu(x, w4, b4)                      # (B, 32, 32, 64)
    img = conv_transpose_final(x, w5, b5)                  # (B, 64, 64) f32
    return img[:, None, :, :]                              # NCHW (nc == 1)


def _ref_conv_transpose(x, w, stride, padding):
    """PyTorch ConvTranspose2d (NCHW, weight (Cin, Cout, kH, kW), no bias)."""
    k = w.shape[-1]
    rhs = jnp.transpose(w[:, :, ::-1, ::-1], (1, 0, 2, 3))   # OIHW, flipped
    q = k - 1 - padding
    return jax.lax.conv_general_dilated(
        x, rhs, window_strides=(1, 1), padding=[(q, q), (q, q)],
        lhs_dilation=(stride, stride),
        dimension_numbers=("NCHW", "OIHW", "NCHW"))


def reference_forward(raw, z):
    x = z
    for i, (w, scale, shift) in enumerate(raw):
        stride, padding = (1, 0) if i == 0 else (2, 1)
        x = _ref_conv_transpose(x, w, stride, padding)
        x = x * scale[None, :, None, None] + shift[None, :, None, None]
        x = jnp.maximum(x, 0.0) if i < 4 else jnp.tanh(x)
    return x


if __name__ == "__main__":
    key = jax.random.PRNGKey(0)
    kz, kp = jax.random.split(key)
    batch = 2
    z = jax.random.normal(kz, (batch, nz, 1, 1), jnp.float32)
    raw = init_raw_params(kp)
    params = preprocess_params(raw)

    _roll_is_jnp_convention()   # resolve the roll-direction probe eagerly

    out = jax.jit(generator_forward)(params, z)
    out = jax.block_until_ready(out)

    assert out.shape == (batch, nc, 64, 64), out.shape
    assert bool(jnp.all(jnp.isfinite(out)))
    assert bool(jnp.all(jnp.abs(out) <= 1.0))   # Tanh output range

    # Numerics vs. pure-JAX f32 reference (bf16 activations/weights tolerance).
    ref = jax.jit(reference_forward)(raw, z)
    ref = jax.block_until_ready(ref)
    tol = 5e-2 * max(1.0, float(jnp.max(jnp.abs(ref))))
    err = float(jnp.max(jnp.abs(out - ref)))
    assert err <= tol, (err, tol)

    print("KERNEL_OK")
</pallas_src>

<mosaic_0001>
module attributes {stable_mosaic.version = 11 : i64} {
  func.func @_probe(%arg0: memref<8x128xf32, #tpu.memory_space<vmem>>, %arg1: memref<8x128xf32, #tpu.memory_space<vmem>>) attributes {dimension_semantics = [], scalar_prefetch = 0 : i64, scratch_operands = 0 : i64, tpu.core_type = #tpu.core_type<tc>} {
    %c0 = arith.constant 0 : index
    %c0_0 = arith.constant 0 : index
    %0 = vector.load %arg0[%c0, %c0_0] : memref<8x128xf32, #tpu.memory_space<vmem>>, vector<8x128xf32>
    %c1_i32 = arith.constant 1 : i32
    %1 = tpu.dynamic_rotate %0 by %c1_i32 dim 0 : vector<8x128xf32>, i32 -> vector<8x128xf32>
    %c0_1 = arith.constant 0 : index
    %c0_2 = arith.constant 0 : index
    %2 = vector.load %arg1[%c0_1, %c0_2] : memref<8x128xf32, #tpu.memory_space<vmem>>, vector<8x128xf32>
    tpu.vector_store %arg1[%c0_1, %c0_2], %1 {strides = array<i32>} : memref<8x128xf32, #tpu.memory_space<vmem>>, vector<8x128xf32>,
    return
  }
}

</mosaic_0001>

<bundles_post_ra>
// kernel: tpu_custom_call.1
= control target key start
LH: loop header
LB: loop body
LE: loop exit
PB: predicated region body
PF: predicated region fallthrough
CT: control target
= control target key end

     0   :  { %6 = vsyncpa [#allocation3], 0  ;;  %s115_s0 = inlined_call_operand.hbm [shape: f32[8,128], index: 0, kind: input, shape index: {}]   ;;  %s116_s1 = inlined_call_operand.hbm [shape: f32[8,128], index: 1, kind: output, shape index: {}]  }
   0x1   :  { %7 = vsyncpa [#allocation4], 0  ;;  %s13_s8 = sshll.u32 %s115_s0, 4  ;;  %s97_s9 = smov [#allocation2]   ;;  %s14_s8 = int_to_ptr.hbm [resolvable:$true] %s13_s8 }
   0x2   :  { %s15_s10 = sshll.u32 %s97_s9, 4  ;;  %s16_s10 = int_to_ptr.vmem [resolvable:$true] %s15_s10 }
   0x3   :  { %18 = dma.hbm_to_vmem [thread:$0]  %s14_s8, 128, %s16_s10, [#allocation3]  }
   0x4   :  { %93 = dma.done.wait [#allocation3], 128  }
   0x5   :  { %94 = vsyncadd [#allocation3], 4294967168  ;;  %s98_s11 = smov [#allocation5]   ;;  %s33_s15 = sshll.u32 %s116_s1, 4  ;;  %v23_v0 = vld [vmem:[#allocation2] sm:$0xff]  ;;  %s34_s15 = int_to_ptr.hbm [resolvable:$true] %s33_s15 }
   0x6   :  { %s31_s12 = sshll.u32 %s98_s11, 4  ;;  %v24_v1 = vrot.slane %v23_v0, 7  ;;  %s32_s12 = int_to_ptr.vmem [resolvable:$true] %s31_s12 }
   0x8   :  { %25 = vst [vmem:[#allocation5] sm:$0xff] %v24_v1 }
   0x9   :  { %36 = dma.vmem_to_hbm [thread:$0]  %s32_s12, 128, %s34_s15, [#allocation4]  }
   0xa   :  { %95 = dma.done.wait [#allocation4], 128  }
   0xb   :  { %96 = vsyncadd [#allocation4], 4294967168 }
   0xc   :  { %41 = vsyncpa [#allocation3], 1 }
   0xd   :  { %42 = vsyncpa [#allocation4], 1 }

</bundles_post_ra>
